<compile_context>
chip_gen: v5e
topology: v5e:2x2
jax: 0.10.0
libtpu: 0.0.40
codegen_flags: <defaults>
</compile_context>

<pallas_src>
import functools

import jax
import jax.numpy as jnp
from jax.experimental import pallas as pl
from jax.experimental.pallas import tpu as pltpu


def _se_kernel(x_ref, w1_ref, w2_ref, out_ref, *, inv_hw):
    x = x_ref[...]                                           # (Nb, C, P) native dtype

    # Squeeze: global average pool over the (zero-padded) spatial lane axis.
    # sum * 1/(H*W) keeps the padding out of the statistics; accumulate in f32.
    pooled = jnp.sum(x.astype(jnp.float32), axis=2) * inv_hw            # (Nb, C)

    # Excitation MLP on the VPU (matmuls are tiny; keep them off the MXU):
    # fc1 -> ReLU -> fc2 -> sigmoid (sigmoid goes to the EUP slot).
    h = jnp.maximum(
        jnp.sum(pooled[:, :, None] * w1_ref[...][None, :, :], axis=1),
        0.0)                                                            # (Nb, Cr)
    gate = jax.nn.sigmoid(
        jnp.sum(h[:, :, None] * w2_ref[...][None, :, :], axis=1))       # (Nb, C)

    # Scale: per-channel gate broadcast over the lane (spatial) axis; store in
    # the streamed dtype with full-width lane-dense stores.
    out_ref[...] = x * gate.astype(x.dtype)[:, :, None]


def se_block(x_nchw, fc1_weight, fc2_weight):
    """SEBlock forward.

    x_nchw    : (N, C, H, W) in its native dtype (f32 or bf16)
    fc1_weight: (C//r, C)  -- PyTorch nn.Linear(C, C//r, bias=False).weight
    fc2_weight: (C, C//r)  -- PyTorch nn.Linear(C//r, C, bias=False).weight
    returns   : (N, C, H, W), same dtype as x_nchw
    """
    N, C, H, W = x_nchw.shape
    HW = H * W
    Cr = fc1_weight.shape[0]
    dtype = x_nchw.dtype
    itemsize = jnp.dtype(dtype).itemsize

    # Lane-dense spatial axis: pad H*W up to a multiple of 128 (zeros).
    P = ((HW + 127) // 128) * 128
    x = x_nchw.reshape(N, C, HW)                 # free view of the NCHW layout
    if P != HW:
        x = jnp.pad(x, ((0, 0), (0, 0), (0, P - HW)))

    # Tiny weights, resident in VMEM across the whole grid (f32).
    w1 = jnp.transpose(fc1_weight).astype(jnp.float32)        # (C, Cr): pooled @ w1
    w2 = jnp.transpose(fc2_weight).astype(jnp.float32)        # (Cr, C): h @ w2

    # Samples per grid step: aim for ~1-4 MiB blocks; the BlockSpec pipeline
    # holds 2x input + 2x output blocks, so keep 4x block under the VMEM budget.
    per_sample = C * P * itemsize
    vmem_budget = 40 * 1024 * 1024               # safe on v5e/v6e (128 MiB) and v7x (64 MiB)
    max_nb = max(1, min((4 * 1024 * 1024) // per_sample,
                        vmem_budget // (4 * per_sample)))
    nb = 1
    for d in range(1, N + 1):
        if N % d == 0 and d <= max_nb:
            nb = d
    grid = (N // nb,)

    bytes_accessed = 2 * N * C * P * itemsize + 2 * C * Cr * 4
    flops = 2 * N * C * HW + 4 * N * C * Cr

    out = pl.pallas_call(
        functools.partial(_se_kernel, inv_hw=1.0 / float(HW)),
        out_shape=jax.ShapeDtypeStruct((N, C, P), dtype),
        grid=grid,
        in_specs=[
            pl.BlockSpec((nb, C, P), lambda n: (n, 0, 0)),    # nb samples per step
            pl.BlockSpec((C, Cr), lambda n: (0, 0)),          # tiny, resident
            pl.BlockSpec((Cr, C), lambda n: (0, 0)),
        ],
        out_specs=pl.BlockSpec((nb, C, P), lambda n: (n, 0, 0)),
        compiler_params=pltpu.CompilerParams(
            dimension_semantics=("parallel",),    # batch blocks shard across TCs (v7x)
            vmem_limit_bytes=48 * 1024 * 1024,    # above v5e's 16 MiB default, under v7x's 64 MiB
        ),
        cost_estimate=pl.CostEstimate(
            flops=flops,
            transcendentals=N * C,
            bytes_accessed=bytes_accessed,
        ),
    )(x, w1, w2)

    if P != HW:
        out = out[:, :, :HW]
    return out.reshape(N, C, H, W)


if __name__ == "__main__":
    # SEBlock(in_channels=32, reduction=16) -> hidden = 2
    N, C, H, W, reduction = 2, 32, 16, 16, 16
    Cr = C // reduction

    key = jax.random.PRNGKey(0)
    kx, k1, k2 = jax.random.split(key, 3)
    x = jax.random.normal(kx, (N, C, H, W), dtype=jnp.float32)
    # PyTorch-layout Linear weights (bias=False).
    fc1_w = 0.1 * jax.random.normal(k1, (Cr, C), dtype=jnp.float32)   # Linear(C, Cr).weight
    fc2_w = 0.1 * jax.random.normal(k2, (C, Cr), dtype=jnp.float32)   # Linear(Cr, C).weight

    out = se_block(x, fc1_w, fc2_w)
    out = jax.block_until_ready(out)
    assert out.shape == (N, C, H, W), out.shape

    # Pure-JAX reference (same math as the PyTorch module).
    pooled = jnp.mean(x, axis=(2, 3))                      # (N, C)
    hid = jnp.maximum(pooled @ fc1_w.T, 0.0)               # (N, Cr)
    gate = jax.nn.sigmoid(hid @ fc2_w.T)                   # (N, C)
    ref = x * gate[:, :, None, None]
    assert jnp.allclose(out, ref, rtol=1e-5, atol=1e-5), \
        float(jnp.max(jnp.abs(out - ref)))

    print("KERNEL_OK")
</pallas_src>

<mosaic_0001>
module attributes {stable_mosaic.version = 11 : i64} {
  func.func @_se_kernel(%arg0: i32, %arg1: memref<2x32x256xf32, #tpu.memory_space<vmem>>, %arg2: memref<32x2xf32, #tpu.memory_space<vmem>>, %arg3: memref<2x32xf32, #tpu.memory_space<vmem>>, %arg4: memref<2x32x256xf32, #tpu.memory_space<vmem>>) attributes {dimension_semantics = [#tpu.dimension_semantics<parallel>], iteration_bounds = array<i64: 1>, scalar_prefetch = 0 : i64, scratch_operands = 0 : i64, tpu.core_type = #tpu.core_type<tc>, window_params = [{transform_indices = @transform_0, window_bounds = array<i64: 2, 32, 256>}, {pipeline_mode = #tpu.pipeline_mode<synchronous>, transform_indices = @transform_1, window_bounds = array<i64: 32, 2>}, {pipeline_mode = #tpu.pipeline_mode<synchronous>, transform_indices = @transform_2, window_bounds = array<i64: 2, 32>}, {transform_indices = @transform_3, window_bounds = array<i64: 2, 32, 256>}]} {
    %c0 = arith.constant 0 : index
    %c0_0 = arith.constant 0 : index
    %c0_1 = arith.constant 0 : index
    %0 = vector.load %arg1[%c0, %c0_0, %c0_1] : memref<2x32x256xf32, #tpu.memory_space<vmem>>, vector<2x32x256xf32>
    %cst = arith.constant dense<0.000000e+00> : vector<2x32xf32>
    %1 = vector.multi_reduction <add>, %0, %cst [2] : vector<2x32x256xf32> to vector<2x32xf32>
    %cst_2 = arith.constant 3.906250e-03 : f32
    %2 = vector.broadcast %cst_2 : f32 to vector<2x32xf32>
    %3 = arith.mulf %1, %2 : vector<2x32xf32>
    %4 = vector.shape_cast %3 : vector<2x32xf32> to vector<2x32x1xf32>
    %c0_3 = arith.constant 0 : index
    %c0_4 = arith.constant 0 : index
    %5 = vector.load %arg2[%c0_3, %c0_4] : memref<32x2xf32, #tpu.memory_space<vmem>>, vector<32x2xf32>
    %6 = vector.shape_cast %5 : vector<32x2xf32> to vector<1x32x2xf32>
    %7 = vector.broadcast %4 : vector<2x32x1xf32> to vector<2x32x2xf32>
    %8 = vector.broadcast %6 : vector<1x32x2xf32> to vector<2x32x2xf32>
    %9 = arith.mulf %7, %8 : vector<2x32x2xf32>
    %cst_5 = arith.constant dense<0.000000e+00> : vector<2x2xf32>
    %10 = vector.multi_reduction <add>, %9, %cst_5 [1] : vector<2x32x2xf32> to vector<2x2xf32>
    %cst_6 = arith.constant 0.000000e+00 : f32
    %11 = vector.broadcast %cst_6 : f32 to vector<2x2xf32>
    %12 = arith.maximumf %10, %11 : vector<2x2xf32>
    %13 = vector.shape_cast %12 : vector<2x2xf32> to vector<2x2x1xf32>
    %c0_7 = arith.constant 0 : index
    %c0_8 = arith.constant 0 : index
    %14 = vector.load %arg3[%c0_7, %c0_8] : memref<2x32xf32, #tpu.memory_space<vmem>>, vector<2x32xf32>
    %15 = vector.shape_cast %14 : vector<2x32xf32> to vector<1x2x32xf32>
    %16 = vector.broadcast %13 : vector<2x2x1xf32> to vector<2x2x32xf32>
    %17 = vector.broadcast %15 : vector<1x2x32xf32> to vector<2x2x32xf32>
    %18 = arith.mulf %16, %17 : vector<2x2x32xf32>
    %cst_9 = arith.constant dense<0.000000e+00> : vector<2x32xf32>
    %19 = vector.multi_reduction <add>, %18, %cst_9 [1] : vector<2x2x32xf32> to vector<2x32xf32>
    %20 = arith.negf %19 : vector<2x32xf32>
    %21 = math.exp %20 : vector<2x32xf32>
    %cst_10 = arith.constant 1.000000e+00 : f32
    %22 = vector.broadcast %cst_10 : f32 to vector<2x32xf32>
    %23 = arith.addf %22, %21 : vector<2x32xf32>
    %24 = arith.divf %22, %23 : vector<2x32xf32>
    %25 = vector.shape_cast %24 : vector<2x32xf32> to vector<2x32x1xf32>
    %26 = vector.broadcast %25 : vector<2x32x1xf32> to vector<2x32x256xf32>
    %27 = arith.mulf %0, %26 : vector<2x32x256xf32>
    %c0_11 = arith.constant 0 : index
    %c0_12 = arith.constant 0 : index
    %c0_13 = arith.constant 0 : index
    %28 = vector.load %arg4[%c0_11, %c0_12, %c0_13] : memref<2x32x256xf32, #tpu.memory_space<vmem>>, vector<2x32x256xf32>
    tpu.vector_store %arg4[%c0_11, %c0_12, %c0_13], %27 {strides = array<i32>} : memref<2x32x256xf32, #tpu.memory_space<vmem>>, vector<2x32x256xf32>,
    return
  }
  func.func @transform_0(%arg0: i32) -> (i32, i32, i32) {
    %c0_i32 = arith.constant 0 : i32
    %c0_i32_0 = arith.constant 0 : i32
    %c0_i32_1 = arith.constant 0 : i32
    return %arg0, %c0_i32, %c0_i32_0 : i32, i32, i32
  }
  func.func @transform_1(%arg0: i32) -> (i32, i32) {
    %c0_i32 = arith.constant 0 : i32
    %c0_i32_0 = arith.constant 0 : i32
    %c0_i32_1 = arith.constant 0 : i32
    return %c0_i32, %c0_i32_0 : i32, i32
  }
  func.func @transform_2(%arg0: i32) -> (i32, i32) {
    %c0_i32 = arith.constant 0 : i32
    %c0_i32_0 = arith.constant 0 : i32
    %c0_i32_1 = arith.constant 0 : i32
    return %c0_i32, %c0_i32_0 : i32, i32
  }
  func.func @transform_3(%arg0: i32) -> (i32, i32, i32) {
    %c0_i32 = arith.constant 0 : i32
    %c0_i32_0 = arith.constant 0 : i32
    %c0_i32_1 = arith.constant 0 : i32
    return %arg0, %c0_i32, %c0_i32_0 : i32, i32, i32
  }
}

</mosaic_0001>

<bundles_post_ra>
// kernel: tpu_custom_call.1
= control target key start
LH: loop header
LB: loop body
LE: loop exit
PB: predicated region body
PF: predicated region fallthrough
CT: control target
= control target key end

     0   :  { %8 = vsyncpa [#allocation3], 0  ;;  %s502_s0 = inlined_call_operand.hbm [shape: f32[2,32,256], index: 0, kind: input, shape index: {}]   ;;  %s503_s1 = inlined_call_operand.vmem [shape: f32[32,2], index: 1, kind: input, shape index: {}]   ;;  %s504_s2 = inlined_call_operand.vmem [shape: f32[2,32], index: 2, kind: input, shape index: {}]   ;;  %s505_s3 = inlined_call_operand.hbm [shape: f32[2,32,256], index: 3, kind: output, shape index: {}]  }
   0x1   :  { %9 = vsyncpa [#allocation4], 0  ;;  %s14_s14 = sshll.u32 %s502_s0, 4  ;;  %s364_s15 = smov [#allocation2]   ;;  %s15_s14 = int_to_ptr.hbm [resolvable:$true] %s14_s14 }
   0x2   :  { %s16_s16 = sshll.u32 %s364_s15, 4  ;;  %s365_s17 = smov 256   ;;  %s17_s16 = int_to_ptr.vmem [resolvable:$true] %s16_s16 }
   0x3   :  { %s366_s18 = smov 16  }
   0x4   :  { %22 = dma.hbm_to_vmem [thread:$0]  %s15_s14, 2048, %s17_s16, [#allocation3], %s365_s17, %s365_s17, %s366_s18  }
   0x5   :  { %360 = dma.done.wait [#allocation3], 2048  }
   0x6   :  { %361 = vsyncadd [#allocation3], 4294965248  ;;  %v394_v0 = vld [vmem:[#allocation2 + $0x40] sm:$0xff]  ;;  %v396_v1 = vld [vmem:[#allocation2 + $0x48] sm:$0xff]  ;;  %v120_v24 = vlaneseq  ;;  %vm91_vm0 = vcmask 15360   ;;  %vm135_vm1 = vcmask 254976  }
   0x7   :  { %v398_v2 = vld [vmem:[#allocation2] sm:$0xff]  ;;  %v59_v3 = vadd.f32 %v396_v1, %v394_v0  ;;  %v402_v4 = vld [vmem:[#allocation2 + $0x8] sm:$0xff]  ;;  %v412_v9 = vld [vmem:[#allocation2 + $0x50] sm:$0xff]  ;;  %s274_s30 = sshll.u32 %s505_s3, 4  ;;  %s275_s30 = int_to_ptr.hbm [resolvable:$true] %s274_s30 }
   0x8   :  { %v404_v5 = vld [vmem:[#allocation2 + $0x20] sm:$0xff]  ;;  %v406_v6 = vld [vmem:[#allocation2 + $0x28] sm:$0xff]  ;;  %v47_v7 = vadd.f32 %v402_v4, %v398_v2  ;;  %v414_v10 = vld [vmem:[#allocation2 + $0x58] sm:$0xff]  ;;  %v442_v25 = vshrl.u32 %v120_v24, 7 }
   0x9   :  { %v53_v8 = vadd.f32 %v406_v6, %v404_v5  ;;  %60 = vadd.xlane.f32.xlu1 %v59_v3  ;;  %v416_v11 = vld [vmem:[#allocation2 + $0x10] sm:$0xff]  ;;  %v418_v12 = vld [vmem:[#allocation2 + $0x18] sm:$0xff]  ;;  %v420_v13 = vld [vmem:[#allocation2 + $0x60] sm:$0xff]  ;;  %v62_v15 = vadd.f32 %v414_v10, %v412_v9 }
   0xa   :  { %48 = vadd.xlane.f32.xlu0 %v47_v7  ;;  %v422_v14 = vld [vmem:[#allocation2 + $0x68] sm:$0xff]  ;;  %v50_v16 = vadd.f32 %v418_v12, %v416_v11  ;;  %v430_v18 = vld [vmem:[#allocation2 + $0x70] sm:$0xff]  ;;  %v432_v19 = vld [vmem:[#allocation2 + $0x78] sm:$0xff]  ;;  %293 = vset.pattern.permute.xlu2 %v442_v25 }
   0xb   :  { %54 = vadd.xlane.f32.xlu2 %v53_v8  ;;  %v65_v17 = vadd.f32 %v422_v14, %v420_v13  ;;  %v434_v20 = vld [vmem:[#allocation2 + $0x30] sm:$0xff]  ;;  %v436_v21 = vld [vmem:[#allocation2 + $0x38] sm:$0xff]  ;;  %v68_v22 = vadd.f32 %v432_v19, %v430_v18  ;;  %294 = vset.pattern.permute.xlu0 %v442_v25  ;;  %v79_v30 = vld [vmem:[%s503_s1] sm:$0xff] }
   0xc   :  { %v56_v23 = vadd.f32 %v436_v21, %v434_v20  ;;  %295 = vset.pattern.permute.xlu1 %v442_v25  ;;  %v80_v32 = vld [vmem:[%s503_s1 + $0x8] sm:$0xff]  ;;  %v81_v38 = vld [vmem:[%s503_s1 + $0x10] sm:$0xff]  ;;  %v82_v52 = vld [vmem:[%s503_s1 + $0x18] sm:$0xff] }
  0x11   :  { %63 = vadd.xlane.f32.xlu1 %v62_v15 }
  0x12   :  { %51 = vadd.xlane.f32.xlu0 %v50_v16 }
  0x13   :  { %66 = vadd.xlane.f32.xlu2 %v65_v17 }
  0x19   :  { %69 = vadd.xlane.f32.xlu1 %v68_v22 }
  0x1a   :  { %57 = vadd.xlane.f32.xlu0 %v56_v23 }
  0x7c   :  { %v61_v26 = vpop.xlane.xlu1 %60 }
  0x7d   :  { %v49_v27 = vpop.xlane.xlu0 %48  ;;  %v75_v29 = vmul.f32 0.00390625, %v61_v26 }
  0x7e   :  { %v55_v28 = vpop.xlane.xlu2 %54  ;;  %v71_v31 = vmul.f32 0.00390625, %v49_v27 }
  0x7f   :  { %v87_v34 = vmul.f32 %v79_v30, %v75_v29  ;;  %v73_v39 = vmul.f32 0.00390625, %v55_v28 }
  0x80   :  { %v83_v43 = vmul.f32 %v79_v30, %v71_v31 }
  0x81   :  { %v105_v45 = vsel %vm91_vm0, %v87_v34, 0.0  ;;  %v85_v48 = vmul.f32 %v81_v38, %v73_v39 }
  0x82   :  { %v92_v50 = vsel %vm91_vm0, %v83_v43, 0.0 }
  0x83   :  { %v95_v58 = vsel %vm91_vm0, %v85_v48, 0.0 }
  0x84   :  { %v64_v33 = vpop.xlane.xlu1 %63 }
  0x85   :  { %v76_v35 = vmul.f32 0.00390625, %v64_v33  ;;  %v52_v36 = vpop.xlane.xlu0 %51 }
  0x86   :  { %v67_v37 = vpop.xlane.xlu2 %66  ;;  %v72_v40 = vmul.f32 0.00390625, %v52_v36 }
  0x87   :  { %v77_v41 = vmul.f32 0.00390625, %v67_v37  ;;  %v88_v42 = vmul.f32 %v80_v32, %v76_v35  ;;  %v132_v35 = vld [vmem:[%s504_s2] sm:$0x3]  ;;  %s367_s2 = smov [#allocation5]  }
  0x88   :  { %v84_v44 = vmul.f32 %v80_v32, %v72_v40  ;;  %s272_s27 = sshll.u32 %s367_s2, 4  ;;  %s273_s27 = int_to_ptr.vmem [resolvable:$true] %s272_s27 }
  0x89   :  { %v106_v46 = vsel %vm91_vm0, %v88_v42, 0.0  ;;  %v89_v47 = vmul.f32 %v81_v38, %v77_v41  ;;  %v471_v38 = vadd.s32 8, %v442_v25 }
  0x8a   :  { %v93_v49 = vsel %vm91_vm0, %v84_v44, 0.0  ;;  %v107_v51 = vadd.f32 %v106_v46, %v105_v45 }
  0x8b   :  { %v94_v54 = vadd.f32 %v93_v49, %v92_v50  ;;  %v108_v55 = vsel %vm91_vm0, %v89_v47, 0.0  ;;  %v202_v47 = vadd.s32 16, %v442_v25 }
  0x8c   :  { %v70_v53 = vpop.xlane.xlu1 %69  ;;  %v109_v61 = vadd.f32 %v108_v55, %v107_v51 }
  0x8d   :  { %v78_v56 = vmul.f32 0.00390625, %v70_v53  ;;  %v58_v57 = vpop.xlane.xlu0 %57  ;;  %v96_v3 = vadd.f32 %v95_v58, %v94_v54 }
  0x8e   :  { %v74_v59 = vmul.f32 0.00390625, %v58_v57 }
  0x8f   :  { %v90_v60 = vmul.f32 %v82_v52, %v78_v56 }
  0x90   :  { %v86_v62 = vmul.f32 %v82_v52, %v74_v59 }
  0x91   :  { %v110_v63 = vsel %vm91_vm0, %v90_v60, 0.0 }
  0x92   :  { %v111_v7 = vadd.f32 %v110_v63, %v109_v61  ;;  %v97_v8 = vsel %vm91_vm0, %v86_v62, 0.0 }
  0x93   :  { %v98_v15 = vadd.f32 %v97_v8, %v96_v3 }
  0x94   :  { %v112_v16 = vrot.slane %v111_v7, 4 }
  0x95   :  { %v99_v17 = vrot.slane %v98_v15, 4 }
  0x96   :  { %v113_v22 = vadd.f32 %v112_v16, %v111_v7 }
  0x97   :  { %v100_v23 = vadd.f32 %v99_v17, %v98_v15 }
  0x98   :  { %v114_v24 = vrot.slane %v113_v22, 2 }
  0x99   :  { %v101_v26 = vrot.slane %v100_v23, 2 }
  0x9a   :  { %v115_v27 = vadd.f32 %v114_v24, %v113_v22  ;;  %v208_v24 = vadd.s32 24, %v442_v25 }
  0x9b   :  { %v102_v28 = vadd.f32 %v101_v26, %v100_v23 }
  0x9c   :  { %v116_v29 = vrot.slane %v115_v27, 1 }
  0x9d   :  { %v103_v30 = vrot.slane %v102_v28, 1 }
  0x9e   :  { %v117_v31 = vadd.f32 %v116_v29, %v115_v27 }
  0x9f   :  { %v104_v32 = vadd.f32 %v103_v30, %v102_v28 }
  0xa0   :  { %v119_v33 = vmax.f32 %v117_v31, 0.0 }
  0xa1   :  { %v118_v34 = vmax.f32 %v104_v32, 0.0 }
  0xa2   :  { %130 = vperm.xlu0 %294, %v119_v33  }
  0xa3   :  { %124 = vperm.xlu2 %293, %v118_v34  }
  0xaa   :  { %301 = vset.pattern.permute.xlu0 %v202_v47 }
  0xab   :  { %296 = vset.pattern.permute.xlu2 %v471_v38 }
  0xfd   :  { %v125_v36 = vpop.permute.xlu2 %124 }
  0xfe   :  { %v133_v37 = vmul.f32 %v132_v35, %v125_v36 }
 0x100   :  { %v136_v39 = vsel %vm135_vm1, %v133_v37, 0.0 }
 0x101   :  { %v137_v40 = vrot.slane %v136_v39, 4 }
 0x103   :  { %v138_v41 = vadd.f32 %v137_v40, %v136_v39 }
 0x105   :  { %v139_v42 = vrot.slane %v138_v41, 2 }
 0x107   :  { %v140_v43 = vadd.f32 %v139_v42, %v138_v41 }
 0x109   :  { %v141_v44 = vrot.slane %v140_v43, 1 }
 0x10b   :  { %v142_v45 = vadd.f32 %v141_v44, %v140_v43 }
 0x10d   :  { %v287_v46 = vmul.f32 -1.442695, %v142_v45 }
 0x10f   :  { %304 = vpow2.f32 %v287_v46 }
 0x114   :  { %v131_v48 = vpop.permute.xlu0 %130 }
 0x115   :  { %v305_v49 = vpop.eup %304  ;;  %v134_v50 = vmul.f32 %v132_v35, %v131_v48 }
 0x116   :  { %v156_v51 = vadd.f32 1.0, %v305_v49 }
 0x117   :  { %v143_v52 = vsel %vm135_vm1, %v134_v50, 0.0 }
 0x118   :  { %306 = vrcp.f32 %v156_v51  ;;  %v144_v53 = vrot.slane %v143_v52, 4  ;;  %v169_v62 = vand.u32 2147483648, %v156_v51  ;;  %v167_v3 = vand.u32 2147483647, %v156_v51 }
 0x119   :  { %vm163_vm3 = vweird.f32 %v156_v51 }
 0x11a   :  { %v145_v54 = vadd.f32 %v144_v53, %v143_v52  ;;  %v170_v15 = vor.u32 1.1754944e-38, %v169_v62  ;;  %vm168_vm5 = vcmp.eq.f32.partialorder %v167_v3, 8.507059e+37 }
 0x11c   :  { %v146_v55 = vrot.slane %v145_v54, 2 }
 0x11e   :  { %v307_v56 = vpop.eup %306  ;;  %v147_v57 = vadd.f32 %v146_v55, %v145_v54 }
 0x11f   :  { %v159_v58 = vmul.f32 %v307_v56, %v156_v51  ;;  %vm164_vm2 = vweird.f32 %v307_v56 }
 0x120   :  { %v148_v59 = vrot.slane %v147_v57, 1  ;;  %vm165_vm4 = vmor %vm163_vm3, %vm164_vm2 }
 0x121   :  { %v160_v60 = vsub.f32 1.0, %v159_v58 }
 0x122   :  { %v149_v61 = vadd.f32 %v148_v59, %v147_v57 }
 0x123   :  { %v161_v63 = vmul.f32 %v307_v56, %v160_v60 }
 0x124   :  { %v288_v7 = vmul.f32 -1.442695, %v149_v61 }
 0x125   :  { %v162_v8 = vadd.f32 %v307_v56, %v161_v63 }
 0x126   :  { %308 = vpow2.f32 %v288_v7 }
 0x127   :  { %v166_v16 = vsel %vm165_vm4, %v307_v56, %v162_v8 }
 0x128   :  { %v171_v17 = vsel %vm168_vm5, %v170_v15, %v166_v16 }
 0x129   :  { %198 = vperm.xlu2 %296, %v171_v17   ;;  %192 = vperm.xlu1 %295, %v171_v17  }
 0x12c   :  { %v309_v22 = vpop.eup %308 }
 0x12d   :  { %v157_v23 = vadd.f32 1.0, %v309_v22 }
 0x12f   :  { %310 = vrcp.f32 %v157_v23  ;;  %v184_v29 = vand.u32 2147483648, %v157_v23  ;;  %v182_v31 = vand.u32 2147483647, %v157_v23  ;;  %vm178_vm7 = vweird.f32 %v157_v23 }
 0x131   :  { %297 = vset.pattern.permute.xlu2 %v202_v47  ;;  %298 = vset.pattern.permute.xlu1 %v208_v24  ;;  %v185_v33 = vor.u32 1.1754944e-38, %v184_v29  ;;  %vm183_vm9 = vcmp.eq.f32.partialorder %v182_v31, 8.507059e+37 }
 0x135   :  { %v311_v26 = vpop.eup %310 }
 0x136   :  { %v174_v27 = vmul.f32 %v311_v26, %v157_v23  ;;  %vm179_vm6 = vweird.f32 %v311_v26 }
 0x137   :  { %vm180_vm8 = vmor %vm178_vm7, %vm179_vm6 }
 0x138   :  { %v175_v28 = vsub.f32 1.0, %v174_v27 }
 0x139   :  { %204 = vperm.xlu2 %297, %v171_v17   ;;  %210 = vperm.xlu1 %298, %v171_v17  }
 0x13a   :  { %v176_v30 = vmul.f32 %v311_v26, %v175_v28 }
 0x13c   :  { %v177_v32 = vadd.f32 %v311_v26, %v176_v30 }
 0x13e   :  { %v181_v34 = vsel %vm180_vm8, %v311_v26, %v177_v32 }
 0x13f   :  { %v186_v35 = vsel %vm183_vm9, %v185_v33, %v181_v34 }
 0x140   :  { %228 = vperm.xlu0 %301, %v186_v35  }
 0x141   :  { %299 = vset.pattern.permute.xlu2 %v442_v25  ;;  %300 = vset.pattern.permute.xlu1 %v471_v38 }
 0x148   :  { %303 = vset.pattern.permute.xlu0 %v208_v24 }
 0x149   :  { %222 = vperm.xlu1 %300, %v186_v35   ;;  %216 = vperm.xlu2 %299, %v186_v35  }
 0x151   :  { %302 = vset.pattern.permute.xlu2 %v208_v24 }
 0x159   :  { %234 = vperm.xlu2 %302, %v186_v35  }
 0x183   :  { %v199_v36 = vpop.permute.xlu2 %198 }
 0x184   :  { %v238_v37 = vmul.f32 %v199_v36, %v416_v11  ;;  %v239_v39 = vmul.f32 %v199_v36, %v418_v12 }
 0x186   :  { %254 = vst [vmem:[#allocation5 + $0x10] sm:$0xff] %v238_v37 }
 0x187   :  { %255 = vst [vmem:[#allocation5 + $0x18] sm:$0xff] %v239_v39 }
 0x193   :  { %v205_v40 = vpop.permute.xlu2 %204 }
 0x194   :  { %v240_v41 = vmul.f32 %v205_v40, %v404_v5  ;;  %v241_v42 = vmul.f32 %v205_v40, %v406_v6 }
 0x196   :  { %256 = vst [vmem:[#allocation5 + $0x20] sm:$0xff] %v240_v41 }
 0x197   :  { %257 = vst [vmem:[#allocation5 + $0x28] sm:$0xff] %v241_v42 }
 0x19b   :  { %v193_v25 = vpop.permute.xlu1 %192 }
 0x19c   :  { %v236_v38 = vmul.f32 %v193_v25, %v398_v2  ;;  %v237_v43 = vmul.f32 %v193_v25, %v402_v4 }
 0x19e   :  { %252 = vst [vmem:[#allocation5] sm:$0xff] %v236_v38 }
 0x19f   :  { %253 = vst [vmem:[#allocation5 + $0x8] sm:$0xff] %v237_v43 }
 0x1a3   :  { %v217_v44 = vpop.permute.xlu2 %216 }
 0x1a4   :  { %v244_v11 = vmul.f32 %v217_v44, %v394_v0  ;;  %v245_v12 = vmul.f32 %v217_v44, %v396_v1 }
 0x1a6   :  { %260 = vst [vmem:[#allocation5 + $0x40] sm:$0xff] %v244_v11 }
 0x1a7   :  { %261 = vst [vmem:[#allocation5 + $0x48] sm:$0xff] %v245_v12 }
 0x1ab   :  { %v211_v45 = vpop.permute.xlu1 %210 }
 0x1ac   :  { %v242_v5 = vmul.f32 %v211_v45, %v434_v20  ;;  %v243_v6 = vmul.f32 %v211_v45, %v436_v21 }
 0x1ae   :  { %258 = vst [vmem:[#allocation5 + $0x30] sm:$0xff] %v242_v5 }
 0x1af   :  { %259 = vst [vmem:[#allocation5 + $0x38] sm:$0xff] %v243_v6 }
 0x1b2   :  { %v229_v46 = vpop.permute.xlu0 %228 }
 0x1b3   :  { %v248_v2 = vmul.f32 %v229_v46, %v420_v13  ;;  %v249_v4 = vmul.f32 %v229_v46, %v422_v14  ;;  %v235_v47 = vpop.permute.xlu2 %234 }
 0x1b4   :  { %v250_v48 = vmul.f32 %v235_v47, %v430_v18  ;;  %v251_v0 = vmul.f32 %v235_v47, %v432_v19 }
 0x1b5   :  { %264 = vst [vmem:[#allocation5 + $0x60] sm:$0xff] %v248_v2 }
 0x1b6   :  { %265 = vst [vmem:[#allocation5 + $0x68] sm:$0xff] %v249_v4 }
 0x1b7   :  { %266 = vst [vmem:[#allocation5 + $0x70] sm:$0xff] %v250_v48 }
 0x1b8   :  { %267 = vst [vmem:[#allocation5 + $0x78] sm:$0xff] %v251_v0 }
 0x1bb   :  { %v223_v1 = vpop.permute.xlu1 %222 }
 0x1bc   :  { %v246_v13 = vmul.f32 %v223_v1, %v412_v9  ;;  %v247_v14 = vmul.f32 %v223_v1, %v414_v10 }
 0x1be   :  { %262 = vst [vmem:[#allocation5 + $0x50] sm:$0xff] %v246_v13 }
 0x1bf   :  { %263 = vst [vmem:[#allocation5 + $0x58] sm:$0xff] %v247_v14 }
 0x1c0   :  { %280 = dma.vmem_to_hbm [thread:$0]  %s273_s27, 2048, %s275_s30, [#allocation4], %s365_s17, %s365_s17, %s366_s18  }
 0x1c1   :  { %362 = dma.done.wait [#allocation4], 2048  }
 0x1c2   :  { %363 = vsyncadd [#allocation4], 4294965248 }
 0x1c3   :  { %285 = vsyncpa [#allocation3], 1 }
 0x1c4   :  { %286 = vsyncpa [#allocation4], 1 }

</bundles_post_ra>
